<compile_context>
chip_gen: v7x
topology: tpu7x:2x2x1
jax: 0.10.0
libtpu: 0.0.40
codegen_flags: <defaults>
</compile_context>

<pallas_src>
import functools
import math

import jax
import jax.numpy as jnp
from jax.experimental import pallas as pl
from jax.experimental.pallas import tpu as pltpu

LEAKY_SLOPE = 0.01          # PyTorch F.leaky_relu default
DILATIONS = (1, 3, 5)       # first-conv dilations per residual block


def _round_up(x, m):
    return (x + m - 1) // m * m


def _leaky_relu(v):
    # For 0 < slope < 1, leaky_relu(v) == max(v, slope*v): 2 VPU ops, not 3.
    return jnp.maximum(v, LEAKY_SLOPE * v)


def _residual_stack_kernel(x_hbm, w_ref, b_ref, o_ref, xwin_ref, rhs_ref, sem,
                           *, K, seq_len, l_tile, halo, w_pad):
    n = pl.program_id(0)
    t = pl.program_id(1)
    num_t = pl.num_programs(1)
    slot = jax.lax.rem(t, 2)

    def fetch(slot_idx, tile_idx):
        start = pl.multiple_of(tile_idx * l_tile, 128)
        pltpu.make_async_copy(x_hbm.at[n, :, pl.ds(start, w_pad)],
                              xwin_ref.at[slot_idx],
                              sem.at[slot_idx]).start()

    # Prime the first tile of this batch row, then keep one window in flight:
    # the DMA for tile t+1 overlaps the compute of tile t.
    @pl.when(t == 0)
    def _():
        fetch(slot, t)

    @pl.when(t + 1 < num_t)
    def _():
        fetch(1 - slot, t + 1)

    # Wait for the current tile's window (issued just above or at step t-1).
    pltpu.make_async_copy(
        x_hbm.at[n, :, pl.ds(pl.multiple_of(t * l_tile, 128), w_pad)],
        xwin_ref.at[slot], sem.at[slot]).wait()

    x = xwin_ref[slot].astype(jnp.float32)       # residual stream, (C, W)
    C = x.shape[0]
    cdt = w_ref.dtype                            # MXU operand dtype (bf16/f32)

    # One shared in-sequence mask per tile (position of window column 0 is
    # t*l_tile - halo in original coordinates).
    # TODO(synk): interior tiles never need the mask; a vector-result lax.cond
    # could skip the 5 select passes there entirely.
    pos = (t * l_tile - halo) + jax.lax.broadcasted_iota(jnp.int32, (1, w_pad), 1)
    in_seq = (pos >= 0) & (pos < seq_len)

    def conv(a, layer, dilation):
        """'same' dilated conv at constant width: K statically shifted copies of
        `a` are packed into the (K*C, W) im2col scratch so the whole conv is a
        single MXU matmul with contraction depth K*C.  Window-edge columns use
        zero-filled taps; they never reach the central l_tile output columns
        (halo covers the stack's full receptive field)."""
        p1 = dilation * (K - 1) // 2
        for k in range(K):
            s = p1 - k * dilation                # static column shift
            rows = slice(k * C, (k + 1) * C)
            if s == 0:
                rhs_ref[rows, :] = a
            elif s > 0:
                rhs_ref[rows, :s] = jnp.zeros((C, s), jnp.float32)
                rhs_ref[rows, s:] = a[:, :w_pad - s]
            else:
                rhs_ref[rows, :w_pad + s] = a[:, -s:]
                rhs_ref[rows, w_pad + s:] = jnp.zeros((C, -s), jnp.float32)
        rhs = rhs_ref[...].astype(cdt)
        return (jnp.dot(w_ref[layer], rhs, preferred_element_type=jnp.float32)
                + b_ref[layer])

    n_blocks = len(DILATIONS)
    for blk, d in enumerate(DILATIONS):
        # out = first_l(leaky_relu(x)), dilation d
        y = conv(_leaky_relu(x), 2 * blk, d)
        # zero out-of-sequence columns == zero padding seen by the second conv
        y = jnp.where(in_seq, y, 0.0)
        # out = second_l(leaky_relu(out)), dilation 1
        y = conv(_leaky_relu(y), 2 * blk + 1, 1)
        # x = x + out; re-zero boundary columns before the next block reads them
        x = x + y
        if blk + 1 < n_blocks:
            x = jnp.where(in_seq, x, 0.0)

    # Central l_tile columns are exact; lane-dense (multiple of 128) store.
    o_ref[0] = x[:, halo:halo + l_tile].astype(o_ref.dtype)


def residual_stack_forward(x, params, *, l_tile=1024,
                           compute_dtype=jnp.bfloat16):
    """x: (N, C, L); params: 3 tuples (w1, b1, w2, b2), w: (C, C, K), b: (C,)."""
    N, C, L = x.shape
    K = params[0][0].shape[-1]
    assert K % 2 == 1, "'same' symmetric padding requires an odd kernel_size"

    # total receptive-field halo of the fused stack, per side
    halo = sum((d + 1) * (K - 1) // 2 for d in DILATIONS)

    # L tile: multiple of 128 (lane-dense unmasked output stores), capped near L.
    l_tile = max(128, min(l_tile, _round_up(L, 128)))
    l_tile = _round_up(l_tile, 128)
    num_tiles = pl.cdiv(L, l_tile)
    L_out = num_tiles * l_tile

    # Constant, 128-aligned window width used by every intermediate op.
    w_pad = _round_up(l_tile + 2 * halo, 128)

    # Single zero-pad replaces every per-conv 'same' pad and keeps all window
    # DMAs in bounds (also rounds L up to a whole number of output tiles).
    # TODO(synk): for mem-bound long sequences drop this pad and zero the halo
    # columns in-kernel with a clamped DMA instead (saves one full HBM pass).
    padded_len = (num_tiles - 1) * l_tile + w_pad
    xp = jnp.pad(x, ((0, 0), (0, 0), (halo, padded_len - halo - L)))

    # Weights folded for single-dot convs: (layer, C_out, K*C_in), the K*C_in
    # axis ordered (k, c_in) to match the im2col scratch rows.  Biases (l, C, 1).
    ws, bs = [], []
    for (w1, b1, w2, b2) in params:
        ws += [w1, w2]
        bs += [b1, b2]
    n_layers = len(ws)
    w_all = jnp.stack([jnp.transpose(w, (0, 2, 1)).reshape(C, K * C)
                       for w in ws]).astype(compute_dtype)
    b_all = jnp.stack(bs).reshape(n_layers, C, 1).astype(jnp.float32)

    kernel = functools.partial(_residual_stack_kernel, K=K, seq_len=L,
                               l_tile=l_tile, halo=halo, w_pad=w_pad)

    out = pl.pallas_call(
        kernel,
        out_shape=jax.ShapeDtypeStruct((N, C, L_out), x.dtype),
        grid_spec=pltpu.PrefetchScalarGridSpec(
            num_scalar_prefetch=0,
            grid=(N, num_tiles),
            in_specs=[
                pl.BlockSpec(memory_space=pl.ANY),    # x stays in HBM; manual DMA
                # TODO(synk): for C >= 512 add pipeline_mode=pl.Buffered(1) here
                # (constant index_map never refetches) to halve weight VMEM.
                pl.BlockSpec((n_layers, C, K * C), lambda n, t: (0, 0, 0)),
                pl.BlockSpec((n_layers, C, 1), lambda n, t: (0, 0, 0)),
            ],
            out_specs=pl.BlockSpec((1, C, l_tile), lambda n, t: (n, 0, t)),
            scratch_shapes=[
                pltpu.VMEM((2, C, w_pad), xp.dtype),        # double-buffered window
                pltpu.VMEM((K * C, w_pad), jnp.float32),    # im2col RHS
                pltpu.SemaphoreType.DMA((2,)),
            ],
        ),
        compiler_params=pltpu.CompilerParams(
            # The L-tile axis must run in order on one core: the manual window
            # DMA for tile t+1 is issued while tile t computes.
            dimension_semantics=("parallel", "arbitrary"),
            vmem_limit_bytes=64 * 1024 * 1024,
        ),
    )(xp, w_all, b_all)
    return out[:, :, :L]


# ---------------- pure-JAX reference (for correctness check) ----------------
def _conv1d_ref(x, w, b, dilation):
    pad = dilation * (w.shape[-1] - 1) // 2
    y = jax.lax.conv_general_dilated(
        x, w, window_strides=(1,), padding=[(pad, pad)],
        rhs_dilation=(dilation,), dimension_numbers=("NCH", "OIH", "NCH"))
    return y + b[None, :, None]


def _ref_forward(x, params):
    for (w1, b1, w2, b2), d in zip(params, DILATIONS):
        out = _conv1d_ref(jax.nn.leaky_relu(x, LEAKY_SLOPE), w1, b1, d)
        out = _conv1d_ref(jax.nn.leaky_relu(out, LEAKY_SLOPE), w2, b2, 1)
        x = x + out
    return x


if __name__ == "__main__":
    N, C, L, K = 2, 4, 16, 3   # batch, n_channels, sequence length, kernel_size

    key = jax.random.PRNGKey(0)
    key, xk = jax.random.split(key)
    x = jax.random.normal(xk, (N, C, L), dtype=jnp.float32)

    # Deterministic Conv1d-style init: U(-1/sqrt(C_in*K), 1/sqrt(C_in*K))
    bound = 1.0 / math.sqrt(C * K)
    params = []
    for _ in range(3):
        key, k1, k2, k3, k4 = jax.random.split(key, 5)
        w1 = jax.random.uniform(k1, (C, C, K), jnp.float32, -bound, bound)
        b1 = jax.random.uniform(k2, (C,), jnp.float32, -bound, bound)
        w2 = jax.random.uniform(k3, (C, C, K), jnp.float32, -bound, bound)
        b2 = jax.random.uniform(k4, (C,), jnp.float32, -bound, bound)
        params.append((w1, b1, w2, b2))

    y_ref = _ref_forward(x, params)

    # Strict check with f32 MXU operands.
    y32 = jax.block_until_ready(
        residual_stack_forward(x, params, compute_dtype=jnp.float32))
    assert y32.shape == (N, C, L)
    assert jnp.allclose(y32, y_ref, atol=1e-5, rtol=1e-5), "f32 mismatch vs reference"

    # Default path: bf16 MXU operands, f32 accumulation (loosened tolerance).
    ybf = jax.block_until_ready(residual_stack_forward(x, params))
    assert ybf.shape == (N, C, L)
    assert jnp.allclose(ybf, y_ref, atol=5e-2, rtol=5e-2), "bf16 mismatch vs reference"

    print("KERNEL_OK")
</pallas_src>

<mosaic_0001>
module attributes {stable_mosaic.version = 11 : i64} {
  func.func @_residual_stack_kernel(%arg0: i32, %arg1: i32, %arg2: memref<2x4x256xf32, #tpu.memory_space<any>>, %arg3: memref<6x4x12xf32, #tpu.memory_space<vmem>>, %arg4: memref<6x4x1xf32, #tpu.memory_space<vmem>>, %arg5: memref<1x4x128xf32, #tpu.memory_space<vmem>>, %arg6: memref<2x4x256xf32, #tpu.memory_space<vmem>>, %arg7: memref<12x256xf32, #tpu.memory_space<vmem>>, %arg8: memref<2x!tpu.dma_semaphore, #tpu.memory_space<semaphore_mem>>) attributes {dimension_semantics = [#tpu.dimension_semantics<parallel>, #tpu.dimension_semantics<arbitrary>], iteration_bounds = array<i64: 2, 1>, scalar_prefetch = 0 : i64, scratch_operands = 3 : i64, tpu.core_type = #tpu.core_type<tc>, window_params = [{}, {pipeline_mode = #tpu.pipeline_mode<synchronous>, transform_indices = @transform_1, window_bounds = array<i64: 6, 4, 12>}, {pipeline_mode = #tpu.pipeline_mode<synchronous>, transform_indices = @transform_2, window_bounds = array<i64: 6, 4, 1>}, {transform_indices = @transform_3, window_bounds = array<i64: 1, 4, 128>}]} {
    %c2_i32 = arith.constant 2 : i32
    %0 = arith.remsi %arg1, %c2_i32 : i32
    %c0_i32 = arith.constant 0 : i32
    %1 = arith.cmpi eq, %arg1, %c0_i32 : i32
    %2 = arith.extui %1 : i1 to i32
    %c0_i32_0 = arith.constant 0 : i32
    %3 = arith.cmpi ne, %2, %c0_i32_0 : i32
    scf.if %3 {
      %c128_i32_139 = arith.constant 128 : i32
      %176 = arith.muli %arg1, %c128_i32_139 : i32
      %177 = tpu.assume_multiple %176, 128 : i32
      %c0_i32_140 = arith.constant 0 : i32
      %178 = tpu.memref_slice %arg2[%arg0, %c0_i32_140, %177] : memref<2x4x256xf32, #tpu.memory_space<any>> -> memref<1x4x256xf32, #tpu.memory_space<any>>
      %179 = tpu.memref_squeeze %178 : memref<1x4x256xf32, #tpu.memory_space<any>> -> memref<4x256xf32, #tpu.memory_space<any>>
      %c0_i32_141 = arith.constant 0 : i32
      %c0_i32_142 = arith.constant 0 : i32
      %180 = tpu.memref_slice %arg6[%0, %c0_i32_141, %c0_i32_142] : memref<2x4x256xf32, #tpu.memory_space<vmem>> -> memref<1x4x256xf32, #tpu.memory_space<vmem>>
      %181 = tpu.memref_squeeze %180 : memref<1x4x256xf32, #tpu.memory_space<vmem>> -> memref<4x256xf32, #tpu.memory_space<vmem>>
      %182 = tpu.memref_slice %arg8[%0] : memref<2x!tpu.dma_semaphore, #tpu.memory_space<semaphore_mem>> -> memref<1x!tpu.dma_semaphore, #tpu.memory_space<semaphore_mem>>
      %183 = tpu.memref_squeeze %182 : memref<1x!tpu.dma_semaphore, #tpu.memory_space<semaphore_mem>> -> memref<!tpu.dma_semaphore, #tpu.memory_space<semaphore_mem>>
      tpu.enqueue_dma source(%179 : memref<4x256xf32, #tpu.memory_space<any>>) target(%181 : memref<4x256xf32, #tpu.memory_space<vmem>>) target_semaphore(%183 : memref<!tpu.dma_semaphore, #tpu.memory_space<semaphore_mem>>)
    } else {
    }
    %c1_i32 = arith.constant 1 : i32
    %4 = arith.addi %arg1, %c1_i32 : i32
    %c1_i32_1 = arith.constant 1 : i32
    %5 = arith.cmpi slt, %4, %c1_i32_1 : i32
    %6 = arith.extui %5 : i1 to i32
    %c0_i32_2 = arith.constant 0 : i32
    %7 = arith.cmpi ne, %6, %c0_i32_2 : i32
    scf.if %7 {
      %c1_i32_139 = arith.constant 1 : i32
      %176 = arith.subi %c1_i32_139, %0 : i32
      %c1_i32_140 = arith.constant 1 : i32
      %177 = arith.addi %arg1, %c1_i32_140 : i32
      %c128_i32_141 = arith.constant 128 : i32
      %178 = arith.muli %177, %c128_i32_141 : i32
      %179 = tpu.assume_multiple %178, 128 : i32
      %c0_i32_142 = arith.constant 0 : i32
      %180 = tpu.memref_slice %arg2[%arg0, %c0_i32_142, %179] : memref<2x4x256xf32, #tpu.memory_space<any>> -> memref<1x4x256xf32, #tpu.memory_space<any>>
      %181 = tpu.memref_squeeze %180 : memref<1x4x256xf32, #tpu.memory_space<any>> -> memref<4x256xf32, #tpu.memory_space<any>>
      %c0_i32_143 = arith.constant 0 : i32
      %c0_i32_144 = arith.constant 0 : i32
      %182 = tpu.memref_slice %arg6[%176, %c0_i32_143, %c0_i32_144] : memref<2x4x256xf32, #tpu.memory_space<vmem>> -> memref<1x4x256xf32, #tpu.memory_space<vmem>>
      %183 = tpu.memref_squeeze %182 : memref<1x4x256xf32, #tpu.memory_space<vmem>> -> memref<4x256xf32, #tpu.memory_space<vmem>>
      %184 = tpu.memref_slice %arg8[%176] : memref<2x!tpu.dma_semaphore, #tpu.memory_space<semaphore_mem>> -> memref<1x!tpu.dma_semaphore, #tpu.memory_space<semaphore_mem>>
      %185 = tpu.memref_squeeze %184 : memref<1x!tpu.dma_semaphore, #tpu.memory_space<semaphore_mem>> -> memref<!tpu.dma_semaphore, #tpu.memory_space<semaphore_mem>>
      tpu.enqueue_dma source(%181 : memref<4x256xf32, #tpu.memory_space<any>>) target(%183 : memref<4x256xf32, #tpu.memory_space<vmem>>) target_semaphore(%185 : memref<!tpu.dma_semaphore, #tpu.memory_space<semaphore_mem>>)
    } else {
    }
    %c128_i32 = arith.constant 128 : i32
    %8 = arith.muli %arg1, %c128_i32 : i32
    %9 = tpu.assume_multiple %8, 128 : i32
    %c0_i32_3 = arith.constant 0 : i32
    %10 = tpu.memref_slice %arg2[%arg0, %c0_i32_3, %9] : memref<2x4x256xf32, #tpu.memory_space<any>> -> memref<1x4x256xf32, #tpu.memory_space<any>>
    %11 = tpu.memref_squeeze %10 : memref<1x4x256xf32, #tpu.memory_space<any>> -> memref<4x256xf32, #tpu.memory_space<any>>
    %c0_i32_4 = arith.constant 0 : i32
    %c0_i32_5 = arith.constant 0 : i32
    %12 = tpu.memref_slice %arg6[%0, %c0_i32_4, %c0_i32_5] : memref<2x4x256xf32, #tpu.memory_space<vmem>> -> memref<1x4x256xf32, #tpu.memory_space<vmem>>
    %13 = tpu.memref_squeeze %12 : memref<1x4x256xf32, #tpu.memory_space<vmem>> -> memref<4x256xf32, #tpu.memory_space<vmem>>
    %14 = tpu.memref_slice %arg8[%0] : memref<2x!tpu.dma_semaphore, #tpu.memory_space<semaphore_mem>> -> memref<1x!tpu.dma_semaphore, #tpu.memory_space<semaphore_mem>>
    %15 = tpu.memref_squeeze %14 : memref<1x!tpu.dma_semaphore, #tpu.memory_space<semaphore_mem>> -> memref<!tpu.dma_semaphore, #tpu.memory_space<semaphore_mem>>
    tpu.wait_dma2 semaphore(%15 : memref<!tpu.dma_semaphore, #tpu.memory_space<semaphore_mem>>) src(%11 : memref<4x256xf32, #tpu.memory_space<any>>) dst(%13 : memref<4x256xf32, #tpu.memory_space<vmem>>)
    %16 = arith.index_cast %0 : i32 to index
    %c0 = arith.constant 0 : index
    %c0_6 = arith.constant 0 : index
    %17 = vector.load %arg6[%16, %c0, %c0_6] : memref<2x4x256xf32, #tpu.memory_space<vmem>>, vector<1x4x256xf32>
    %18 = vector.shape_cast %17 : vector<1x4x256xf32> to vector<4x256xf32>
    %c128_i32_7 = arith.constant 128 : i32
    %19 = arith.muli %arg1, %c128_i32_7 : i32
    %c12_i32 = arith.constant 12 : i32
    %20 = arith.subi %19, %c12_i32 : i32
    %21 = tpu.iota {dimensions = array<i32: 1>} : vector<1x256xi32>
    %22 = vector.broadcast %20 : i32 to vector<1x256xi32>
    %23 = arith.addi %22, %21 : vector<1x256xi32>
    %c0_i32_8 = arith.constant 0 : i32
    %24 = vector.broadcast %c0_i32_8 : i32 to vector<1x256xi32>
    %25 = arith.cmpi sge, %23, %24 : vector<1x256xi32>
    %c16_i32 = arith.constant 16 : i32
    %26 = vector.broadcast %c16_i32 : i32 to vector<1x256xi32>
    %27 = arith.cmpi slt, %23, %26 : vector<1x256xi32>
    %28 = arith.andi %25, %27 : vector<1x256xi1>
    %cst = arith.constant 0.00999999977 : f32
    %29 = vector.broadcast %cst : f32 to vector<4x256xf32>
    %30 = arith.mulf %29, %18 : vector<4x256xf32>
    %31 = arith.maximumf %18, %30 : vector<4x256xf32>
    %cst_9 = arith.constant 0.000000e+00 : f32
    %32 = vector.broadcast %cst_9 : f32 to vector<4x1xf32>
    %c0_10 = arith.constant 0 : index
    %c0_11 = arith.constant 0 : index
    %33 = vector.load %arg7[%c0_10, %c0_11] : memref<12x256xf32, #tpu.memory_space<vmem>>, vector<4x1xf32>
    tpu.vector_store %arg7[%c0_10, %c0_11], %32 {strides = array<i32>} : memref<12x256xf32, #tpu.memory_space<vmem>>, vector<4x1xf32>,
    %34 = vector.extract_strided_slice %31 {offsets = [0, 0], sizes = [4, 255], strides = [1, 1]} : vector<4x256xf32> to vector<4x255xf32>
    %c0_12 = arith.constant 0 : index
    %c1 = arith.constant 1 : index
    %35 = vector.load %arg7[%c0_12, %c1] : memref<12x256xf32, #tpu.memory_space<vmem>>, vector<4x255xf32>
    tpu.vector_store %arg7[%c0_12, %c1], %34 {strides = array<i32>} : memref<12x256xf32, #tpu.memory_space<vmem>>, vector<4x255xf32>,
    %c4 = arith.constant 4 : index
    %c0_13 = arith.constant 0 : index
    %36 = vector.load %arg7[%c4, %c0_13] : memref<12x256xf32, #tpu.memory_space<vmem>>, vector<4x256xf32>
    tpu.vector_store %arg7[%c4, %c0_13], %31 {strides = array<i32>} : memref<12x256xf32, #tpu.memory_space<vmem>>, vector<4x256xf32>,
    %37 = vector.extract_strided_slice %31 {offsets = [0, 1], sizes = [4, 255], strides = [1, 1]} : vector<4x256xf32> to vector<4x255xf32>
    %c8 = arith.constant 8 : index
    %c0_14 = arith.constant 0 : index
    %38 = vector.load %arg7[%c8, %c0_14] : memref<12x256xf32, #tpu.memory_space<vmem>>, vector<4x255xf32>
    tpu.vector_store %arg7[%c8, %c0_14], %37 {strides = array<i32>} : memref<12x256xf32, #tpu.memory_space<vmem>>, vector<4x255xf32>,
    %cst_15 = arith.constant 0.000000e+00 : f32
    %39 = vector.broadcast %cst_15 : f32 to vector<4x1xf32>
    %c8_16 = arith.constant 8 : index
    %c255 = arith.constant 255 : index
    %40 = vector.load %arg7[%c8_16, %c255] : memref<12x256xf32, #tpu.memory_space<vmem>>, vector<4x1xf32>
    tpu.vector_store %arg7[%c8_16, %c255], %39 {strides = array<i32>} : memref<12x256xf32, #tpu.memory_space<vmem>>, vector<4x1xf32>,
    %c0_17 = arith.constant 0 : index
    %c0_18 = arith.constant 0 : index
    %41 = vector.load %arg7[%c0_17, %c0_18] : memref<12x256xf32, #tpu.memory_space<vmem>>, vector<12x256xf32>
    %c0_19 = arith.constant 0 : index
    %c0_20 = arith.constant 0 : index
    %c0_21 = arith.constant 0 : index
    %42 = vector.load %arg3[%c0_19, %c0_20, %c0_21] : memref<6x4x12xf32, #tpu.memory_space<vmem>>, vector<1x4x12xf32>
    %43 = vector.shape_cast %42 : vector<1x4x12xf32> to vector<4x12xf32>
    %cst_22 = arith.constant dense<0.000000e+00> : vector<4x256xf32>
    %44 = tpu.matmul %43, %41, %cst_22 {dimension_numbers = #tpu.dot_dimension_numbers<[1], [0], [0], [1], [0, 0, 1, 1], [], []>} : vector<4x12xf32>, vector<12x256xf32>, vector<4x256xf32> -> vector<4x256xf32>
    %c0_23 = arith.constant 0 : index
    %c0_24 = arith.constant 0 : index
    %c0_25 = arith.constant 0 : index
    %45 = vector.load %arg4[%c0_23, %c0_24, %c0_25] : memref<6x4x1xf32, #tpu.memory_space<vmem>>, vector<1x4x1xf32>
    %46 = vector.shape_cast %45 : vector<1x4x1xf32> to vector<4x1xf32>
    %47 = vector.broadcast %46 : vector<4x1xf32> to vector<4x256xf32>
    %48 = arith.addf %44, %47 : vector<4x256xf32>
    %cst_26 = arith.constant 0.000000e+00 : f32
    %49 = vector.shape_cast %28 : vector<1x256xi1> to vector<1x256xi1>
    %50 = vector.broadcast %49 : vector<1x256xi1> to vector<4x256xi1>
    %51 = vector.broadcast %cst_26 : f32 to vector<4x256xf32>
    %52 = arith.select %50, %48, %51 : vector<4x256xi1>, vector<4x256xf32>
    %cst_27 = arith.constant 0.00999999977 : f32
    %53 = vector.broadcast %cst_27 : f32 to vector<4x256xf32>
    %54 = arith.mulf %53, %52 : vector<4x256xf32>
    %55 = arith.maximumf %52, %54 : vector<4x256xf32>
    %cst_28 = arith.constant 0.000000e+00 : f32
    %56 = vector.broadcast %cst_28 : f32 to vector<4x1xf32>
    %c0_29 = arith.constant 0 : index
    %c0_30 = arith.constant 0 : index
    %57 = vector.load %arg7[%c0_29, %c0_30] : memref<12x256xf32, #tpu.memory_space<vmem>>, vector<4x1xf32>
    tpu.vector_store %arg7[%c0_29, %c0_30], %56 {strides = array<i32>} : memref<12x256xf32, #tpu.memory_space<vmem>>, vector<4x1xf32>,
    %58 = vector.extract_strided_slice %55 {offsets = [0, 0], sizes = [4, 255], strides = [1, 1]} : vector<4x256xf32> to vector<4x255xf32>
    %c0_31 = arith.constant 0 : index
    %c1_32 = arith.constant 1 : index
    %59 = vector.load %arg7[%c0_31, %c1_32] : memref<12x256xf32, #tpu.memory_space<vmem>>, vector<4x255xf32>
    tpu.vector_store %arg7[%c0_31, %c1_32], %58 {strides = array<i32>} : memref<12x256xf32, #tpu.memory_space<vmem>>, vector<4x255xf32>,
    %c4_33 = arith.constant 4 : index
    %c0_34 = arith.constant 0 : index
    %60 = vector.load %arg7[%c4_33, %c0_34] : memref<12x256xf32, #tpu.memory_space<vmem>>, vector<4x256xf32>
    tpu.vector_store %arg7[%c4_33, %c0_34], %55 {strides = array<i32>} : memref<12x256xf32, #tpu.memory_space<vmem>>, vector<4x256xf32>,
    %61 = vector.extract_strided_slice %55 {offsets = [0, 1], sizes = [4, 255], strides = [1, 1]} : vector<4x256xf32> to vector<4x255xf32>
    %c8_35 = arith.constant 8 : index
    %c0_36 = arith.constant 0 : index
    %62 = vector.load %arg7[%c8_35, %c0_36] : memref<12x256xf32, #tpu.memory_space<vmem>>, vector<4x255xf32>
    tpu.vector_store %arg7[%c8_35, %c0_36], %61 {strides = array<i32>} : memref<12x256xf32, #tpu.memory_space<vmem>>, vector<4x255xf32>,
    %cst_37 = arith.constant 0.000000e+00 : f32
    %63 = vector.broadcast %cst_37 : f32 to vector<4x1xf32>
    %c8_38 = arith.constant 8 : index
    %c255_39 = arith.constant 255 : index
    %64 = vector.load %arg7[%c8_38, %c255_39] : memref<12x256xf32, #tpu.memory_space<vmem>>, vector<4x1xf32>
    tpu.vector_store %arg7[%c8_38, %c255_39], %63 {strides = array<i32>} : memref<12x256xf32, #tpu.memory_space<vmem>>, vector<4x1xf32>,
    %c0_40 = arith.constant 0 : index
    %c0_41 = arith.constant 0 : index
    %65 = vector.load %arg7[%c0_40, %c0_41] : memref<12x256xf32, #tpu.memory_space<vmem>>, vector<12x256xf32>
    %c1_42 = arith.constant 1 : index
    %c0_43 = arith.constant 0 : index
    %c0_44 = arith.constant 0 : index
    %66 = vector.load %arg3[%c1_42, %c0_43, %c0_44] : memref<6x4x12xf32, #tpu.memory_space<vmem>>, vector<1x4x12xf32>
    %67 = vector.shape_cast %66 : vector<1x4x12xf32> to vector<4x12xf32>
    %cst_45 = arith.constant dense<0.000000e+00> : vector<4x256xf32>
    %68 = tpu.matmul %67, %65, %cst_45 {dimension_numbers = #tpu.dot_dimension_numbers<[1], [0], [0], [1], [0, 0, 1, 1], [], []>} : vector<4x12xf32>, vector<12x256xf32>, vector<4x256xf32> -> vector<4x256xf32>
    %c1_46 = arith.constant 1 : index
    %c0_47 = arith.constant 0 : index
    %c0_48 = arith.constant 0 : index
    %69 = vector.load %arg4[%c1_46, %c0_47, %c0_48] : memref<6x4x1xf32, #tpu.memory_space<vmem>>, vector<1x4x1xf32>
    %70 = vector.shape_cast %69 : vector<1x4x1xf32> to vector<4x1xf32>
    %71 = vector.broadcast %70 : vector<4x1xf32> to vector<4x256xf32>
    %72 = arith.addf %68, %71 : vector<4x256xf32>
    %73 = arith.addf %18, %72 : vector<4x256xf32>
    %cst_49 = arith.constant 0.000000e+00 : f32
    %74 = vector.shape_cast %28 : vector<1x256xi1> to vector<1x256xi1>
    %75 = vector.broadcast %74 : vector<1x256xi1> to vector<4x256xi1>
    %76 = vector.broadcast %cst_49 : f32 to vector<4x256xf32>
    %77 = arith.select %75, %73, %76 : vector<4x256xi1>, vector<4x256xf32>
    %cst_50 = arith.constant 0.00999999977 : f32
    %78 = vector.broadcast %cst_50 : f32 to vector<4x256xf32>
    %79 = arith.mulf %78, %77 : vector<4x256xf32>
    %80 = arith.maximumf %77, %79 : vector<4x256xf32>
    %cst_51 = arith.constant 0.000000e+00 : f32
    %81 = vector.broadcast %cst_51 : f32 to vector<4x3xf32>
    %c0_52 = arith.constant 0 : index
    %c0_53 = arith.constant 0 : index
    %82 = vector.load %arg7[%c0_52, %c0_53] : memref<12x256xf32, #tpu.memory_space<vmem>>, vector<4x3xf32>
    tpu.vector_store %arg7[%c0_52, %c0_53], %81 {strides = array<i32>} : memref<12x256xf32, #tpu.memory_space<vmem>>, vector<4x3xf32>,
    %83 = vector.extract_strided_slice %80 {offsets = [0, 0], sizes = [4, 253], strides = [1, 1]} : vector<4x256xf32> to vector<4x253xf32>
    %c0_54 = arith.constant 0 : index
    %c3 = arith.constant 3 : index
    %84 = vector.load %arg7[%c0_54, %c3] : memref<12x256xf32, #tpu.memory_space<vmem>>, vector<4x253xf32>
    tpu.vector_store %arg7[%c0_54, %c3], %83 {strides = array<i32>} : memref<12x256xf32, #tpu.memory_space<vmem>>, vector<4x253xf32>,
    %c4_55 = arith.constant 4 : index
    %c0_56 = arith.constant 0 : index
    %85 = vector.load %arg7[%c4_55, %c0_56] : memref<12x256xf32, #tpu.memory_space<vmem>>, vector<4x256xf32>
    tpu.vector_store %arg7[%c4_55, %c0_56], %80 {strides = array<i32>} : memref<12x256xf32, #tpu.memory_space<vmem>>, vector<4x256xf32>,
    %86 = vector.extract_strided_slice %80 {offsets = [0, 3], sizes = [4, 253], strides = [1, 1]} : vector<4x256xf32> to vector<4x253xf32>
    %c8_57 = arith.constant 8 : index
    %c0_58 = arith.constant 0 : index
    %87 = vector.load %arg7[%c8_57, %c0_58] : memref<12x256xf32, #tpu.memory_space<vmem>>, vector<4x253xf32>
    tpu.vector_store %arg7[%c8_57, %c0_58], %86 {strides = array<i32>} : memref<12x256xf32, #tpu.memory_space<vmem>>, vector<4x253xf32>,
    %cst_59 = arith.constant 0.000000e+00 : f32
    %88 = vector.broadcast %cst_59 : f32 to vector<4x3xf32>
    %c8_60 = arith.constant 8 : index
    %c253 = arith.constant 253 : index
    %89 = vector.load %arg7[%c8_60, %c253] : memref<12x256xf32, #tpu.memory_space<vmem>>, vector<4x3xf32>
    tpu.vector_store %arg7[%c8_60, %c253], %88 {strides = array<i32>} : memref<12x256xf32, #tpu.memory_space<vmem>>, vector<4x3xf32>,
    %c0_61 = arith.constant 0 : index
    %c0_62 = arith.constant 0 : index
    %90 = vector.load %arg7[%c0_61, %c0_62] : memref<12x256xf32, #tpu.memory_space<vmem>>, vector<12x256xf32>
    %c2 = arith.constant 2 : index
    %c0_63 = arith.constant 0 : index
    %c0_64 = arith.constant 0 : index
    %91 = vector.load %arg3[%c2, %c0_63, %c0_64] : memref<6x4x12xf32, #tpu.memory_space<vmem>>, vector<1x4x12xf32>
    %92 = vector.shape_cast %91 : vector<1x4x12xf32> to vector<4x12xf32>
    %cst_65 = arith.constant dense<0.000000e+00> : vector<4x256xf32>
    %93 = tpu.matmul %92, %90, %cst_65 {dimension_numbers = #tpu.dot_dimension_numbers<[1], [0], [0], [1], [0, 0, 1, 1], [], []>} : vector<4x12xf32>, vector<12x256xf32>, vector<4x256xf32> -> vector<4x256xf32>
    %c2_66 = arith.constant 2 : index
    %c0_67 = arith.constant 0 : index
    %c0_68 = arith.constant 0 : index
    %94 = vector.load %arg4[%c2_66, %c0_67, %c0_68] : memref<6x4x1xf32, #tpu.memory_space<vmem>>, vector<1x4x1xf32>
    %95 = vector.shape_cast %94 : vector<1x4x1xf32> to vector<4x1xf32>
    %96 = vector.broadcast %95 : vector<4x1xf32> to vector<4x256xf32>
    %97 = arith.addf %93, %96 : vector<4x256xf32>
    %cst_69 = arith.constant 0.000000e+00 : f32
    %98 = vector.shape_cast %28 : vector<1x256xi1> to vector<1x256xi1>
    %99 = vector.broadcast %98 : vector<1x256xi1> to vector<4x256xi1>
    %100 = vector.broadcast %cst_69 : f32 to vector<4x256xf32>
    %101 = arith.select %99, %97, %100 : vector<4x256xi1>, vector<4x256xf32>
    %cst_70 = arith.constant 0.00999999977 : f32
    %102 = vector.broadcast %cst_70 : f32 to vector<4x256xf32>
    %103 = arith.mulf %102, %101 : vector<4x256xf32>
    %104 = arith.maximumf %101, %103 : vector<4x256xf32>
    %cst_71 = arith.constant 0.000000e+00 : f32
    %105 = vector.broadcast %cst_71 : f32 to vector<4x1xf32>
    %c0_72 = arith.constant 0 : index
    %c0_73 = arith.constant 0 : index
    %106 = vector.load %arg7[%c0_72, %c0_73] : memref<12x256xf32, #tpu.memory_space<vmem>>, vector<4x1xf32>
    tpu.vector_store %arg7[%c0_72, %c0_73], %105 {strides = array<i32>} : memref<12x256xf32, #tpu.memory_space<vmem>>, vector<4x1xf32>,
    %107 = vector.extract_strided_slice %104 {offsets = [0, 0], sizes = [4, 255], strides = [1, 1]} : vector<4x256xf32> to vector<4x255xf32>
    %c0_74 = arith.constant 0 : index
    %c1_75 = arith.constant 1 : index
    %108 = vector.load %arg7[%c0_74, %c1_75] : memref<12x256xf32, #tpu.memory_space<vmem>>, vector<4x255xf32>
    tpu.vector_store %arg7[%c0_74, %c1_75], %107 {strides = array<i32>} : memref<12x256xf32, #tpu.memory_space<vmem>>, vector<4x255xf32>,
    %c4_76 = arith.constant 4 : index
    %c0_77 = arith.constant 0 : index
    %109 = vector.load %arg7[%c4_76, %c0_77] : memref<12x256xf32, #tpu.memory_space<vmem>>, vector<4x256xf32>
    tpu.vector_store %arg7[%c4_76, %c0_77], %104 {strides = array<i32>} : memref<12x256xf32, #tpu.memory_space<vmem>>, vector<4x256xf32>,
    %110 = vector.extract_strided_slice %104 {offsets = [0, 1], sizes = [4, 255], strides = [1, 1]} : vector<4x256xf32> to vector<4x255xf32>
    %c8_78 = arith.constant 8 : index
    %c0_79 = arith.constant 0 : index
    %111 = vector.load %arg7[%c8_78, %c0_79] : memref<12x256xf32, #tpu.memory_space<vmem>>, vector<4x255xf32>
    tpu.vector_store %arg7[%c8_78, %c0_79], %110 {strides = array<i32>} : memref<12x256xf32, #tpu.memory_space<vmem>>, vector<4x255xf32>,
    %cst_80 = arith.constant 0.000000e+00 : f32
    %112 = vector.broadcast %cst_80 : f32 to vector<4x1xf32>
    %c8_81 = arith.constant 8 : index
    %c255_82 = arith.constant 255 : index
    %113 = vector.load %arg7[%c8_81, %c255_82] : memref<12x256xf32, #tpu.memory_space<vmem>>, vector<4x1xf32>
    tpu.vector_store %arg7[%c8_81, %c255_82], %112 {strides = array<i32>} : memref<12x256xf32, #tpu.memory_space<vmem>>, vector<4x1xf32>,
    %c0_83 = arith.constant 0 : index
    %c0_84 = arith.constant 0 : index
    %114 = vector.load %arg7[%c0_83, %c0_84] : memref<12x256xf32, #tpu.memory_space<vmem>>, vector<12x256xf32>
    %c3_85 = arith.constant 3 : index
    %c0_86 = arith.constant 0 : index
    %c0_87 = arith.constant 0 : index
    %115 = vector.load %arg3[%c3_85, %c0_86, %c0_87] : memref<6x4x12xf32, #tpu.memory_space<vmem>>, vector<1x4x12xf32>
    %116 = vector.shape_cast %115 : vector<1x4x12xf32> to vector<4x12xf32>
    %cst_88 = arith.constant dense<0.000000e+00> : vector<4x256xf32>
    %117 = tpu.matmul %116, %114, %cst_88 {dimension_numbers = #tpu.dot_dimension_numbers<[1], [0], [0], [1], [0, 0, 1, 1], [], []>} : vector<4x12xf32>, vector<12x256xf32>, vector<4x256xf32> -> vector<4x256xf32>
    %c3_89 = arith.constant 3 : index
    %c0_90 = arith.constant 0 : index
    %c0_91 = arith.constant 0 : index
    %118 = vector.load %arg4[%c3_89, %c0_90, %c0_91] : memref<6x4x1xf32, #tpu.memory_space<vmem>>, vector<1x4x1xf32>
    %119 = vector.shape_cast %118 : vector<1x4x1xf32> to vector<4x1xf32>
    %120 = vector.broadcast %119 : vector<4x1xf32> to vector<4x256xf32>
    %121 = arith.addf %117, %120 : vector<4x256xf32>
    %122 = arith.addf %77, %121 : vector<4x256xf32>
    %cst_92 = arith.constant 0.000000e+00 : f32
    %123 = vector.shape_cast %28 : vector<1x256xi1> to vector<1x256xi1>
    %124 = vector.broadcast %123 : vector<1x256xi1> to vector<4x256xi1>
    %125 = vector.broadcast %cst_92 : f32 to vector<4x256xf32>
    %126 = arith.select %124, %122, %125 : vector<4x256xi1>, vector<4x256xf32>
    %cst_93 = arith.constant 0.00999999977 : f32
    %127 = vector.broadcast %cst_93 : f32 to vector<4x256xf32>
    %128 = arith.mulf %127, %126 : vector<4x256xf32>
    %129 = arith.maximumf %126, %128 : vector<4x256xf32>
    %cst_94 = arith.constant 0.000000e+00 : f32
    %130 = vector.broadcast %cst_94 : f32 to vector<4x5xf32>
    %c0_95 = arith.constant 0 : index
    %c0_96 = arith.constant 0 : index
    %131 = vector.load %arg7[%c0_95, %c0_96] : memref<12x256xf32, #tpu.memory_space<vmem>>, vector<4x5xf32>
    tpu.vector_store %arg7[%c0_95, %c0_96], %130 {strides = array<i32>} : memref<12x256xf32, #tpu.memory_space<vmem>>, vector<4x5xf32>,
    %132 = vector.extract_strided_slice %129 {offsets = [0, 0], sizes = [4, 251], strides = [1, 1]} : vector<4x256xf32> to vector<4x251xf32>
    %c0_97 = arith.constant 0 : index
    %c5 = arith.constant 5 : index
    %133 = vector.load %arg7[%c0_97, %c5] : memref<12x256xf32, #tpu.memory_space<vmem>>, vector<4x251xf32>
    tpu.vector_store %arg7[%c0_97, %c5], %132 {strides = array<i32>} : memref<12x256xf32, #tpu.memory_space<vmem>>, vector<4x251xf32>,
    %c4_98 = arith.constant 4 : index
    %c0_99 = arith.constant 0 : index
    %134 = vector.load %arg7[%c4_98, %c0_99] : memref<12x256xf32, #tpu.memory_space<vmem>>, vector<4x256xf32>
    tpu.vector_store %arg7[%c4_98, %c0_99], %129 {strides = array<i32>} : memref<12x256xf32, #tpu.memory_space<vmem>>, vector<4x256xf32>,
    %135 = vector.extract_strided_slice %129 {offsets = [0, 5], sizes = [4, 251], strides = [1, 1]} : vector<4x256xf32> to vector<4x251xf32>
    %c8_100 = arith.constant 8 : index
    %c0_101 = arith.constant 0 : index
    %136 = vector.load %arg7[%c8_100, %c0_101] : memref<12x256xf32, #tpu.memory_space<vmem>>, vector<4x251xf32>
    tpu.vector_store %arg7[%c8_100, %c0_101], %135 {strides = array<i32>} : memref<12x256xf32, #tpu.memory_space<vmem>>, vector<4x251xf32>,
    %cst_102 = arith.constant 0.000000e+00 : f32
    %137 = vector.broadcast %cst_102 : f32 to vector<4x5xf32>
    %c8_103 = arith.constant 8 : index
    %c251 = arith.constant 251 : index
    %138 = vector.load %arg7[%c8_103, %c251] : memref<12x256xf32, #tpu.memory_space<vmem>>, vector<4x5xf32>
    tpu.vector_store %arg7[%c8_103, %c251], %137 {strides = array<i32>} : memref<12x256xf32, #tpu.memory_space<vmem>>, vector<4x5xf32>,
    %c0_104 = arith.constant 0 : index
    %c0_105 = arith.constant 0 : index
    %139 = vector.load %arg7[%c0_104, %c0_105] : memref<12x256xf32, #tpu.memory_space<vmem>>, vector<12x256xf32>
    %c4_106 = arith.constant 4 : index
    %c0_107 = arith.constant 0 : index
    %c0_108 = arith.constant 0 : index
    %140 = vector.load %arg3[%c4_106, %c0_107, %c0_108] : memref<6x4x12xf32, #tpu.memory_space<vmem>>, vector<1x4x12xf32>
    %141 = vector.shape_cast %140 : vector<1x4x12xf32> to vector<4x12xf32>
    %cst_109 = arith.constant dense<0.000000e+00> : vector<4x256xf32>
    %142 = tpu.matmul %141, %139, %cst_109 {dimension_numbers = #tpu.dot_dimension_numbers<[1], [0], [0], [1], [0, 0, 1, 1], [], []>} : vector<4x12xf32>, vector<12x256xf32>, vector<4x256xf32> -> vector<4x256xf32>
    %c4_110 = arith.constant 4 : index
    %c0_111 = arith.constant 0 : index
    %c0_112 = arith.constant 0 : index
    %143 = vector.load %arg4[%c4_110, %c0_111, %c0_112] : memref<6x4x1xf32, #tpu.memory_space<vmem>>, vector<1x4x1xf32>
    %144 = vector.shape_cast %143 : vector<1x4x1xf32> to vector<4x1xf32>
    %145 = vector.broadcast %144 : vector<4x1xf32> to vector<4x256xf32>
    %146 = arith.addf %142, %145 : vector<4x256xf32>
    %cst_113 = arith.constant 0.000000e+00 : f32
    %147 = vector.shape_cast %28 : vector<1x256xi1> to vector<1x256xi1>
    %148 = vector.broadcast %147 : vector<1x256xi1> to vector<4x256xi1>
    %149 = vector.broadcast %cst_113 : f32 to vector<4x256xf32>
    %150 = arith.select %148, %146, %149 : vector<4x256xi1>, vector<4x256xf32>
    %cst_114 = arith.constant 0.00999999977 : f32
    %151 = vector.broadcast %cst_114 : f32 to vector<4x256xf32>
    %152 = arith.mulf %151, %150 : vector<4x256xf32>
    %153 = arith.maximumf %150, %152 : vector<4x256xf32>
    %cst_115 = arith.constant 0.000000e+00 : f32
    %154 = vector.broadcast %cst_115 : f32 to vector<4x1xf32>
    %c0_116 = arith.constant 0 : index
    %c0_117 = arith.constant 0 : index
    %155 = vector.load %arg7[%c0_116, %c0_117] : memref<12x256xf32, #tpu.memory_space<vmem>>, vector<4x1xf32>
    tpu.vector_store %arg7[%c0_116, %c0_117], %154 {strides = array<i32>} : memref<12x256xf32, #tpu.memory_space<vmem>>, vector<4x1xf32>,
    %156 = vector.extract_strided_slice %153 {offsets = [0, 0], sizes = [4, 255], strides = [1, 1]} : vector<4x256xf32> to vector<4x255xf32>
    %c0_118 = arith.constant 0 : index
    %c1_119 = arith.constant 1 : index
    %157 = vector.load %arg7[%c0_118, %c1_119] : memref<12x256xf32, #tpu.memory_space<vmem>>, vector<4x255xf32>
    tpu.vector_store %arg7[%c0_118, %c1_119], %156 {strides = array<i32>} : memref<12x256xf32, #tpu.memory_space<vmem>>, vector<4x255xf32>,
    %c4_120 = arith.constant 4 : index
    %c0_121 = arith.constant 0 : index
    %158 = vector.load %arg7[%c4_120, %c0_121] : memref<12x256xf32, #tpu.memory_space<vmem>>, vector<4x256xf32>
    tpu.vector_store %arg7[%c4_120, %c0_121], %153 {strides = array<i32>} : memref<12x256xf32, #tpu.memory_space<vmem>>, vector<4x256xf32>,
    %159 = vector.extract_strided_slice %153 {offsets = [0, 1], sizes = [4, 255], strides = [1, 1]} : vector<4x256xf32> to vector<4x255xf32>
    %c8_122 = arith.constant 8 : index
    %c0_123 = arith.constant 0 : index
    %160 = vector.load %arg7[%c8_122, %c0_123] : memref<12x256xf32, #tpu.memory_space<vmem>>, vector<4x255xf32>
    tpu.vector_store %arg7[%c8_122, %c0_123], %159 {strides = array<i32>} : memref<12x256xf32, #tpu.memory_space<vmem>>, vector<4x255xf32>,
    %cst_124 = arith.constant 0.000000e+00 : f32
    %161 = vector.broadcast %cst_124 : f32 to vector<4x1xf32>
    %c8_125 = arith.constant 8 : index
    %c255_126 = arith.constant 255 : index
    %162 = vector.load %arg7[%c8_125, %c255_126] : memref<12x256xf32, #tpu.memory_space<vmem>>, vector<4x1xf32>
    tpu.vector_store %arg7[%c8_125, %c255_126], %161 {strides = array<i32>} : memref<12x256xf32, #tpu.memory_space<vmem>>, vector<4x1xf32>,
    %c0_127 = arith.constant 0 : index
    %c0_128 = arith.constant 0 : index
    %163 = vector.load %arg7[%c0_127, %c0_128] : memref<12x256xf32, #tpu.memory_space<vmem>>, vector<12x256xf32>
    %c5_129 = arith.constant 5 : index
    %c0_130 = arith.constant 0 : index
    %c0_131 = arith.constant 0 : index
    %164 = vector.load %arg3[%c5_129, %c0_130, %c0_131] : memref<6x4x12xf32, #tpu.memory_space<vmem>>, vector<1x4x12xf32>
    %165 = vector.shape_cast %164 : vector<1x4x12xf32> to vector<4x12xf32>
    %cst_132 = arith.constant dense<0.000000e+00> : vector<4x256xf32>
    %166 = tpu.matmul %165, %163, %cst_132 {dimension_numbers = #tpu.dot_dimension_numbers<[1], [0], [0], [1], [0, 0, 1, 1], [], []>} : vector<4x12xf32>, vector<12x256xf32>, vector<4x256xf32> -> vector<4x256xf32>
    %c5_133 = arith.constant 5 : index
    %c0_134 = arith.constant 0 : index
    %c0_135 = arith.constant 0 : index
    %167 = vector.load %arg4[%c5_133, %c0_134, %c0_135] : memref<6x4x1xf32, #tpu.memory_space<vmem>>, vector<1x4x1xf32>
    %168 = vector.shape_cast %167 : vector<1x4x1xf32> to vector<4x1xf32>
    %169 = vector.broadcast %168 : vector<4x1xf32> to vector<4x256xf32>
    %170 = arith.addf %166, %169 : vector<4x256xf32>
    %171 = arith.addf %126, %170 : vector<4x256xf32>
    %172 = vector.extract_strided_slice %171 {offsets = [0, 12], sizes = [4, 128], strides = [1, 1]} : vector<4x256xf32> to vector<4x128xf32>
    %c0_136 = arith.constant 0 : index
    %c0_137 = arith.constant 0 : index
    %c0_138 = arith.constant 0 : index
    %173 = vector.load %arg5[%c0_136, %c0_137, %c0_138] : memref<1x4x128xf32, #tpu.memory_space<vmem>>, vector<1x4x128xf32>
    %174 = vector.shape_cast %173 : vector<1x4x128xf32> to vector<4x128xf32>
    %175 = vector.shape_cast %172 : vector<4x128xf32> to vector<1x4x128xf32>
    tpu.vector_store %arg5[%c0_136, %c0_137, %c0_138], %175 {strides = array<i32>} : memref<1x4x128xf32, #tpu.memory_space<vmem>>, vector<1x4x128xf32>,
    return
  }
  func.func @transform_1(%arg0: i32, %arg1: i32) -> (i32, i32, i32) {
    %c0_i32 = arith.constant 0 : i32
    %c0_i32_0 = arith.constant 0 : i32
    %c0_i32_1 = arith.constant 0 : i32
    %c0_i32_2 = arith.constant 0 : i32
    return %c0_i32, %c0_i32_0, %c0_i32_1 : i32, i32, i32
  }
  func.func @transform_2(%arg0: i32, %arg1: i32) -> (i32, i32, i32) {
    %c0_i32 = arith.constant 0 : i32
    %c0_i32_0 = arith.constant 0 : i32
    %c0_i32_1 = arith.constant 0 : i32
    %c0_i32_2 = arith.constant 0 : i32
    return %c0_i32, %c0_i32_0, %c0_i32_1 : i32, i32, i32
  }
  func.func @transform_3(%arg0: i32, %arg1: i32) -> (i32, i32, i32) {
    %c0_i32 = arith.constant 0 : i32
    %c0_i32_0 = arith.constant 0 : i32
    return %arg0, %c0_i32, %arg1 : i32, i32, i32
  }
}

</mosaic_0001>

<bundles_post_ra>
// kernel: tpu_custom_call.1
= control target key start
LH: loop header
LB: loop body
LE: loop exit
PB: predicated region body
PF: predicated region fallthrough
CT: control target
= control target key end

     0   :  { %8 = vsyncpa [#allocation6], 0  ;;  %s1888_s0 = inlined_call_operand.hbm [shape: f32[2,4,256], index: 0, kind: input, shape index: {}]   ;;  %s1889_s1 = inlined_call_operand.hbm [shape: f32[6,4,12], index: 1, kind: input, shape index: {}]   ;;  %s1890_s2 = inlined_call_operand.hbm [shape: f32[6,4,1], index: 2, kind: input, shape index: {}]   ;;  %s1891_s3 = inlined_call_operand.hbm [shape: f32[2,4,128], index: 3, kind: output, shape index: {}]  }
   0x1   :  { %9 = vsyncpa [#allocation9], 0 }
   0x2   :  { %10 = vsyncpa [#allocation7], 0 }
   0x3   :  { %12 = vsyncpa [#allocation7 + $0x1], 0  ;;  %s1546_s12 = smov 0   ;;  %s1548_s13 = smov 0  }
   0x4   :  { %s1550_s14 = smov 0   ;;  %s1552_s15 = smov 0  }
   0x5   :  { %s1554_s16 = smov 0   ;;  %s1556_s17 = smov 0  }
   0x6 LB: > { %s1173_s18 = sadd.s32 4294967295, %s1508_s17   ;;  %s1174_s19 = sadd.s32 4294967294, %s1508_s17   ;;  %s1508_s17 = sphi %s1556_s17, %s18_s17   ;;  %s1504_s16 = sphi %s1554_s16, %s1913_s16   ;;  %s1500_s15 = sphi %s1552_s15, %s1912_s15   ;;  %s1496_s14 = sphi %s1550_s14, %s1911_s14   ;;  %s1492_s13 = sphi %s1548_s13, %s1910_s13   ;;  %s1488_s12 = sphi %s1546_s12, %s1909_s12  }
   0x7   : > { %s30_s20 = sadd.s32 1, %s1504_s16  ;;  %s81_s21 = sadd.s32 1, %s1496_s14 }
   0x8   : > { %p32_p0 = scmp.ge.s32.totalorder %s30_s20, 2  ;;  %p91_p1 = scmp.ne.s32.totalorder %s1496_s14, %s1492_s13 }
   0x9   : > { %p92_p2 = scmp.eq.s32.totalorder %s1173_s18, 1  ;;  %p97_p3 = scmp.ne.s32.totalorder %s1492_s13, %s1488_s12 }
   0xa   : > { %s1915_s20 = smov (%p32_p0, %s30_s20), 0  ;;  %p98_p5 = scmp.eq.s32.totalorder %s1174_s19, 1 }
   0xb   : > { %p1586_p4 = por %p92_p2, %p91_p1  ;;  %s76_s23 = ssub.s32 %s1504_s16, %s1915_s20 }
   0xc   : > { %p1175_p6 = scmp.ge.s32.totalorder %s1508_s17, 1  ;;  %p79_p7 = scmp.eq.s32.totalorder %s76_s23, 0 }
   0xd   : > { %s1896_s22 = scalar_select %p1586_p4, 1, 0 }
   0xe   : > { %p1593_p8 = por %p98_p5, %p97_p3  ;;  %p105_p9 = scmp.lt.s32.totalorder %s1508_s17, 3 }
   0xf   : > { %s1599_s25 = scalar_select %p79_p7, %s1496_s14, %s81_s21  }
  0x10   : > { %s1897_s24 = scalar_select %p1593_p8, 1, 0 }
  0x11   : > { %p1601_p10 = pnand %p1175_p6, %p105_p9  ;;  %p1605_p11 = scmp.eq.s32.totalorder %s1173_s18, 0 }
  0x12   : > { %s1510_s28 = smov [#allocation5]   ;;  %s1511_s4 = smov [#allocation8]  }
  0x13   : > { %s1898_s26 = scalar_select %p1601_p10, 1, 0 }
  0x14   : > { %s1899_s27 = scalar_select %p1605_p11, 1, 0 }
  0x15   : > { %p1259_p12 = pneg %p1601_p10  ;;  %s117_s29 = sshll.u32 %s1510_s28, 4  ;;  %s118_s29 = int_to_ptr.vmem [resolvable:$true] %s117_s29 }
  0x16   : > { %s130_s5 = sshll.u32 %s1511_s4, 4  ;;  %s1340_s8 = scalar_lea.hbm %s1889_s1, 384  ;;  %s1617_s5 = int_to_ptr.vmem [resolvable:$true] %s130_s5 }
  0x17   : > { %p1613_p13 = pnand %p1605_p11, %p1259_p12  ;;  %p1341_p0 = scmp.ne.s32.totalorder %s1889_s1, %s1340_s8 }
  0x18   : > { %p1347_p5 = scmp.lt.u32.totalorder %s1340_s8, %s1889_s1 }
  0x19   : > { %p1342_p1 = pneg %p1613_p13 }
  0x1b   : > { %p1343_p2 = pnand %p1342_p1, %p1341_p0 }
  0x1d   : > { %p1344_p3 = pneg %p1343_p2 }
  0x1f   : > { %p1349_p6 = pnand %p1347_p5, %p1344_p3 }
  0x21   : > { %1352 = shalt.err (!%p1349_p6)
}
  0x22   : > { %s1353_s19 = scalar_lea.vmem %s118_s29, 384  ;;  %p1361_p8 = scmp.lt.s32.totalorder %s118_s29, %s118_s29 }
  0x23   : > { %p1354_p7 = scmp.ne.s32.totalorder %s118_s29, %s1353_s19  ;;  %p1362_p4 = scmp.lt.s32.totalorder %s1353_s19, %s1353_s19 }
  0x25   : > { %p1356_p9 = pnand %p1354_p7, %p1342_p1  ;;  %p1363_p11 = por %p1362_p4, %p1361_p8 }
  0x27   : > { %p1357_p12 = pneg %p1356_p9 }
  0x29   : > { %p1364_p10 = pnand %p1363_p11, %p1357_p12 }
  0x2b   : > { %1367 = shalt.err (!%p1364_p10)
}
  0x2c   : > { %s1512_s21 = smov 64   ;;  %s1513_s23 = smov 4  }
  0x2d   : > { %1262 = dma.hbm_to_vmem [thread:$0]  (!%p1613_p13), %s1889_s1, 384, %s118_s29, [#allocation6], %s1512_s21, %s1512_s21, %s1513_s23  }
  0x2e   : > { %s1368_s8 = scalar_lea.hbm %s1890_s2, 384 }
  0x2f   : > { %p1369_p0 = scmp.ne.s32.totalorder %s1890_s2, %s1368_s8  ;;  %p1375_p10 = scmp.lt.u32.totalorder %s1368_s8, %s1890_s2 }
  0x31   : > { %p1371_p4 = pnand %p1369_p0, %p1342_p1 }
  0x33   : > { %p1372_p8 = pneg %p1371_p4 }
  0x35   : > { %p1377_p11 = pnand %p1375_p10, %p1372_p8 }
  0x37   : > { %1380 = shalt.err (!%p1377_p11)
}
  0x38   : > { %s1381_s29 = scalar_lea.vmem %s1617_s5, 384  ;;  %p1389_p6 = scmp.lt.s32.totalorder %s1617_s5, %s1617_s5 }
  0x39   : > { %p1382_p2 = scmp.ne.s32.totalorder %s1617_s5, %s1381_s29  ;;  %p1390_p7 = scmp.lt.s32.totalorder %s1381_s29, %s1381_s29 }
  0x3b   : > { %p1384_p3 = pnand %p1382_p2, %p1342_p1  ;;  %p1391_p9 = por %p1390_p7, %p1389_p6 }
  0x3d   : > { %p1385_p5 = pneg %p1384_p3 }
  0x3f   : > { %p1392_p12 = pnand %p1391_p9, %p1385_p5 }
  0x41   : > { %1395 = shalt.err (!%p1392_p12)
}
  0x42   : > { %1265 = dma.hbm_to_vmem [thread:$0]  (!%p1613_p13), %s1890_s2, 384, %s1617_s5, [#allocation9], %s1512_s21, %s1512_s21, %s1513_s23  }
  0x43   : > { %p1901_p0 = scmp.ne.s32.totalorder %s1898_s26, 0 }
  0x44   : > { %p1902_p4 = scmp.ne.s32.totalorder (!%p1901_p0), %s1899_s27, 0 }
  0x45   : > { %146 = sbr.rel (%p1901_p0) target bundleno = 2362 (0x93a), region = 28 }
  0x4c   : > { %1473 = dma.done.wait (%p1902_p4), [#allocation6], 384  }
  0x4d   : > { %1475 = vsyncadd (%p1902_p4), [#allocation6], 4294966912 }
  0x4e   : > { %1477 = dma.done.wait (%p1902_p4), [#allocation9], 384  }
  0x4f   : > { %1479 = vsyncadd (%p1902_p4), [#allocation9], 4294966912  ;;  %s164_s30 = sand.u32 1, %s1492_s13   ;;  %s1210_s5 = sshll.u32 %s1500_s15, 7 }
  0x50   : > { %s1680_s26 = sshll.u32 %s164_s30, 2  ;;  %s183_s4 = scalar_lea.hbm %s1888_s0, %s1210_s5 }
  0x51   : > { %s1514_s6 = smov [#allocation2]   ;;  %s1396_s8 = scalar_lea.hbm %s183_s4, 128 }
  0x52   : > { %s195_s7 = sshll.u32 %s1514_s6, 4  ;;  %p1397_p13 = scmp.ne.s32.totalorder %s183_s4, %s1396_s8  ;;  %s196_s7 = int_to_ptr.vmem [resolvable:$true] %s195_s7 }
  0x53   : > { %s1398_s10 = scalar_lea.hbm %s1888_s0, 256  ;;  %p1399_p1 = scmp.lt.u32.totalorder %s183_s4, %s1888_s0 }
  0x54   : > { %p1400_p8 = scmp.lt.u32.totalorder %s1398_s10, %s1396_s8  ;;  %p1402_p11 = scmp.lt.u32.totalorder %s1396_s8, %s183_s4 }
  0x56   : > { %p1401_p10 = por %p1400_p8, %p1399_p1 }
  0x58   : > { %p1403_p2 = por %p1402_p11, %p1401_p10 }
  0x5a   : > { %p1404_p3 = pnand %p1403_p2, %p1397_p13 }
  0x5c   : > { %1407 = shalt.err (!%p1404_p3)  }
  0x5d   : > { %s1408_s29 = scalar_lea.vmem %s196_s7, 128  ;;  %s1412_s19 = scalar_lea.vmem %s196_s7, 256 }
  0x5e   : > { %p1409_p5 = scmp.ne.s32.totalorder %s196_s7, %s1408_s29  ;;  %p1413_p6 = scmp.lt.s32.totalorder %s196_s7, %s196_s7 }
  0x5f   : > { %p1414_p7 = scmp.lt.s32.totalorder %s1412_s19, %s1408_s29 }
  0x61   : > { %p1415_p9 = por %p1414_p7, %p1413_p6 }
  0x63   : > { %p1416_p12 = pnand %p1415_p9, %p1409_p5 }
  0x65   : > { %1419 = shalt.err (!%p1416_p12)  }
  0x66   : > { %198 = dma.hbm_to_vmem [thread:$0]  %s183_s4, 128, %s196_s7, [#allocation4] }
  0x67   : > { %s166_s28 = scalar_lea.vmem [#allocation10], %s1680_s26 }
  0x68   : > { %1480 = dma.done.wait [#allocation4], 128 }
  0x69   : > { %1481 = vsyncadd [#allocation4], 4294967168  ;;  %vm252_vm0 = vcmask 3072   ;;  %v1515_v0 = vmov 0.0   ;;  %v1696_v1 = vld [vmem:[#allocation2] sm:$0xff]  ;;  %s1516_s5 = smov 1   ;;  %v238_v25 = vlaneseq }
  0x6a   : > { %253 = vst.msk [vmem:[#allocation3] sm:$0xf] %vm252_vm0, %v1515_v0  ;;  %370 = vmatprep.mubr.f32.mxu0 %v1515_v0  ;;  %501 = vmatprep.mubr.f32.mxu1 %v1515_v0  ;;  %v250_v2 = vmul.f32 0.01, %v1696_v1  ;;  %s1517_s21 = smov 127   ;;  %v1518_v7 = vmov 0  }
  0x6b   : > { %v289_v6 = vld [vmem:[#allocation8] sm:$0xf]  ;;  %1338 = vset.pattern.permute.xlu0 %v1518_v7  ;;  %1339 = vset.pattern.permute.xlu1 %v1518_v7  ;;  %v422_v8 = vld [vmem:[#allocation8 + $0x4] sm:$0xf]  ;;  %vm264_vm1 = vcmask 1043464   ;;  %vm280_vm2 = vcmask 1035264  }
  0x6c   : > { %v251_v3 = vmax.f32 %v1696_v1, %v250_v2  ;;  %vm282_vm3 = vcmask 1044472   ;;  %vm260_vm4 = vcmask 7168   ;;  %vm275_vm5 = vcmask 1039360   ;;  %v288_v22 = vld [vmem:[#allocation5] sm:$0xf]  ;;  %s1520_s23 = smov 3  }
  0x6d   : > { %vm299_vm6 = vcmask 1043456   ;;  %vm1519_vm7 = vmmov 1   ;;  %vm295_vm9 = vcmask 97280   ;;  %v239_v26 = vand.u32 127, %v238_v25  ;;  %v420_v48 = vld [vmem:[#allocation5 + $0x4] sm:$0xf] }
  0x6e   : > { %256 = vrot.lane.b32.xlu0 %v251_v3, %s1516_s5  ;;  %v267_v4 = vcombine.low %v251_v3, %v251_v3  ;;  %270 = vst [vmem:[#allocation3 + $0x8] sm:$0xf0] %v251_v3  ;;  %v255_v5 = vcombine.high %v251_v3, %v251_v3  ;;  %vm1716_vm8 = vmpackc.low %vm299_vm6, %vm1519_vm7  ;;  %v1730_v28 = vrot.slane %v1515_v0, 4  ;;  %vm522_vm13 = vcmask 19456   ;;  %s1521_s4 = smov 125   ;;  %s1522_s6 = smov 5  }
  0x6f   : > { %v242_v27 = vadd.s32 4294967284, %v239_v26  ;;  %v563_v60 = vld [vmem:[#allocation8 + $0x8] sm:$0xf]  ;;  %vm530_vm14 = vcmask 23552   ;;  %vm534_vm15 = vcmask 1043480   ;;  %vm547_vm6 = vcmask 1022976  }
  0x70   : > { %269 = vst [vmem:[#allocation3] sm:$0xf0] %v267_v4  ;;  %273 = vrot.lane.b32.xlu1 %v255_v5, %s1517_s21  ;;  %vm552_vm7 = vcmask 1018880   ;;  %s1523_s7 = smov 123   ;;  %s1524_s8 = smov 116  }
  0x71   : > { %vm244_vm10 = vcmp.ge.s32.totalorder %v242_v27, 0  ;;  %vm246_vm11 = vcmp.lt.s32.totalorder %v242_v27, 16  ;;  %s1205_s9 = sshll.u32 %s1500_s15, 6  ;;  %s1065_s27 = sshll.u32 %s166_s28, 4  ;;  %s1839_s27 = int_to_ptr.vmem [resolvable:$true] %s1065_s27 }
  0x72   : > { %258 = vrot.lane.b32.xlu0 %v255_v5, %s1516_s5  ;;  %vm1733_vm12 = vmand %vm244_vm10, %vm246_vm11  ;;  %vm554_vm10 = vcmask 1044456   ;;  %vm784_vm11 = vcmask 35840   ;;  %s1837_s18 = scalar_lea.hbm %s1891_s3, %s1205_s9  ;;  %s1051_s15 = scalar_lea.sflag [#allocation7], %s164_s30 }
  0x73   : > { %s1420_s29 = scalar_lea.vmem %s1839_s27, 64  ;;  %p1907_p4 = scmp.ne.s32.totalorder %s1896_s22, 0 }
  0x74   : > { %271 = vrot.lane.b32.xlu1 %v251_v3, %s1517_s21  ;;  %p1421_p0 = scmp.ne.s32.totalorder %s1839_s27, %s1420_s29  ;;  %s1525_s19 = smov [#allocation10]  }
  0x76   : > { %292 = vperm.xlu0 %1338, %v289_v6   ;;  %p1422_p13 = pnand %p1421_p0, %p1907_p4 }
  0x78   : > { %392 = vrot.lane.b32.xlu1 %v1515_v0, %s1516_s5  ;;  %p1423_p1 = pneg %p1422_p13 }
  0x7a   : > { %407 = vrot.lane.b32.xlu0 %v1515_v0, %s1517_s21 }
  0x7e   : > { %425 = vperm.xlu0 %1338, %v422_v8  }
  0x82   : > { %528 = vrot.lane.b32.xlu0 %v1515_v0, %s1520_s23 }
  0xe0   : > { %v257_v9 = vpop.permute.xlu0 %256 }
  0xe1   : > { %265 = vst.msk [vmem:[#allocation3] sm:$0xf] %vm264_vm1, %v257_v9 }
  0xe2   : > { %v274_v10 = vpop.permute.xlu1 %273 }
  0xe3   : > { %281 = vst.msk [vmem:[#allocation3 + $0x18] sm:$0xf] %vm280_vm2, %v274_v10 }
  0xe4   : > { %283 = vst.msk [vmem:[#allocation3 + $0x18] sm:$0xf] %vm282_vm3, %v1515_v0  ;;  %v259_v11 = vpop.permute.xlu0 %258 }
  0xe5   : > { %v261_v12 = vsel %vm260_vm4, %v257_v9, %v259_v11 }
  0xe6   : > { %266 = vst [vmem:[#allocation3 + $0x8] sm:$0xf] %v261_v12  ;;  %v272_v13 = vpop.permute.xlu1 %271 }
  0xe7   : > { %v276_v14 = vsel %vm275_vm5, %v272_v13, %v274_v10  ;;  %v561_v10 = vld [vmem:[#allocation5 + $0x8] sm:$0xf] }
  0xe8   : > { %v284_v15 = vld [vmem:[#allocation3] sm:$0xff]  ;;  %279 = vst [vmem:[#allocation3 + $0x10] sm:$0xf] %v276_v14 }
  0xe9   : > { %387 = vst.msk [vmem:[#allocation3] sm:$0xf] %vm252_vm0, %v1515_v0 }
  0xea   : > { %v393_v37 = vpop.permute.xlu1 %392 }
  0xeb   : > { %v287_v16 = vld [vmem:[#allocation3 + $0x18] sm:$0xf] }
  0xed   : > { %v285_v17 = vld [vmem:[#allocation3 + $0x8] sm:$0xff] }
  0xee   : > { %v1213_v19 = vpack.c.bf16 %v287_v16, %v285_v17  ;;  %404 = vst [vmem:[#allocation3 + $0x8] sm:$0xf0] %v1730_v28 }
  0xef   : > { %v286_v20 = vld [vmem:[#allocation3 + $0x10] sm:$0xf] }
  0xf0   : > { %1215 = vmatprep.subr.msk.bf16.mxu0 %vm1716_vm8, %v1213_v19  ;;  %v1216_v21 = vpack.c.bf16 %v286_v20, %v284_v15  ;;  %v690_v20 = vld [vmem:[#allocation8 + $0xc] sm:$0xf] }
  0xf2   : > { %1218 = vmatpush1.bf16.msk.msra.mxu0 %vm1716_vm8, %v1216_v21 }
  0xf5   : > { %1188 = vmatmul.mubr.msk.f32.vlgmr.msra.gmra.mrb[0].mxu0 %vm295_vm9, %v288_v22  ;;  %v293_v23 = vpop.permute.xlu0 %292 }
  0xf6   : > { %642 = vmatprep.mubr.f32.mxu0 %v1515_v0 }
  0xf9   : > { %v408_v24 = vpop.permute.xlu0 %407 }
  0xfa   : > { %413 = vst.msk [vmem:[#allocation3 + $0x18] sm:$0xf] %vm280_vm2, %v408_v24 }
  0xfb   : > { %414 = vst.msk [vmem:[#allocation3 + $0x18] sm:$0xf] %vm282_vm3, %v1515_v0 }
  0xfd   : > { %v426_v49 = vpop.permute.xlu0 %425 }
 0x101   : > { %v529_v61 = vpop.permute.xlu0 %528 }
 0x102   : > { %v418_v42 = vld [vmem:[#allocation3 + $0x18] sm:$0xf] }
 0x1c8   : > { %v372_v30 = vpop.f32.mrb[0].mxu0 }
 0x1c9   : > { %v373_v31 = vadd.f32 %v372_v30, %v293_v23  ;;  %v374_v32 = vpop.f32.mrb[1].mxu0 }
 0x1cb   : > { %v381_v33 = vsel %vm1733_vm12, %v373_v31, 0.0 }
 0x1cc   : > { %v383_v34 = vmul.f32 0.01, %v381_v33 }
 0x1ce   : > { %v385_v35 = vmax.f32 %v381_v33, %v383_v34 }
 0x1d0   : > { %v399_v36 = vrot.slane %v385_v35, 4  ;;  %390 = vrot.lane.b32.xlu1 %v385_v35, %s1516_s5 }
 0x1d2   : > { %403 = vst [vmem:[#allocation3] sm:$0xf0] %v399_v36 }
 0x1d4   : > { %405 = vrot.lane.b32.xlu1 %v385_v35, %s1517_s21  ;;  %v688_v35 = vld [vmem:[#allocation5 + $0xc] sm:$0xf] }
 0x242   : > { %v391_v38 = vpop.permute.xlu1 %390 }
 0x243   : > { %v394_v39 = vsel %vm260_vm4, %v391_v38, %v393_v37  ;;  %397 = vst.msk [vmem:[#allocation3] sm:$0xf] %vm264_vm1, %v391_v38 }
 0x244   : > { %398 = vst [vmem:[#allocation3 + $0x8] sm:$0xf] %v394_v39 }
 0x246   : > { %v406_v40 = vpop.permute.xlu1 %405 }
 0x247   : > { %v409_v41 = vsel %vm275_vm5, %v406_v40, %v408_v24 }
 0x248   : > { %412 = vst [vmem:[#allocation3 + $0x10] sm:$0xf] %v409_v41 }
 0x24a   : > { %v415_v43 = vld [vmem:[#allocation3] sm:$0xff] }
 0x24b   : > { %523 = vst.msk [vmem:[#allocation3] sm:$0xf] %vm522_vm13, %v1515_v0  ;;  %v416_v44 = vld [vmem:[#allocation3 + $0x8] sm:$0xff]  ;;  %vm792_vm13 = vcmask 39936  }
 0x24c   : > { %v1219_v45 = vpack.c.bf16 %v418_v42, %v416_v44  ;;  %542 = vst [vmem:[#allocation3 + $0x8] sm:$0xf0] %v1730_v28 }
 0x24e   : > { %1221 = vmatprep.subr.msk.bf16.mxu1 %vm1716_vm8, %v1219_v45  ;;  %v825_v45 = vld [vmem:[#allocation8 + $0x10] sm:$0xf] }
 0x24f   : > { %v417_v46 = vld [vmem:[#allocation3 + $0x10] sm:$0xf] }
 0x250   : > { %v1222_v47 = vpack.c.bf16 %v417_v46, %v415_v43 }
 0x252   : > { %1224 = vmatpush1.bf16.msk.msra.mxu1 %vm1716_vm8, %v1222_v47 }
 0x255   : > { %1191 = vmatmul.mubr.msk.f32.vlgmr.msra.gmra.mrb[0].mxu1 %vm295_vm9, %v420_v48 }
 0x256   : > { %769 = vmatprep.mubr.f32.mxu1 %v1515_v0 }
 0x328   : > { %v503_v50 = vpop.f32.mrb[0].mxu1 }
 0x329   : > { %v504_v51 = vadd.f32 %v503_v50, %v426_v49  ;;  %v505_v52 = vpop.f32.mrb[1].mxu1 }
 0x32a   : > { %v506_v53 = vadd.f32 %v505_v52, %v426_v49 }
 0x32c   : > { %v510_v54 = vcombine.low %v504_v51, %v506_v53 }
 0x32e   : > { %v512_v55 = vadd.f32 %v510_v54, %v1696_v1 }
 0x330   : > { %v1756_v56 = vsel %vm1733_vm12, %v512_v55, 0.0 }
 0x331   : > { %v518_v57 = vmul.f32 0.01, %v1756_v56 }
 0x333   : > { %v520_v58 = vmax.f32 %v1756_v56, %v518_v57 }
 0x335   : > { %543 = vrot.lane.b32.xlu0 %v520_v58, %s1521_s4  ;;  %v537_v59 = vrot.slane %v520_v58, 4  ;;  %526 = vrot.lane.b32.xlu1 %v520_v58, %s1520_s23  ;;  %v823_v58 = vld [vmem:[#allocation5 + $0x10] sm:$0xf] }
 0x337   : > { %541 = vst [vmem:[#allocation3] sm:$0xf0] %v537_v59 }
 0x339   : > { %545 = vrot.lane.b32.xlu1 %v1515_v0, %s1521_s4 }
 0x33d   : > { %566 = vperm.xlu1 %1339, %v563_v60  }
 0x341   : > { %660 = vrot.lane.b32.xlu1 %v1515_v0, %s1516_s5 }
 0x3a7   : > { %v527_v62 = vpop.permute.xlu1 %526  ;;  %v544_v1 = vpop.permute.xlu0 %543 }
 0x3a8   : > { %v531_v63 = vsel %vm530_vm14, %v527_v62, %v529_v61  ;;  %535 = vst.msk [vmem:[#allocation3] sm:$0xf] %vm534_vm15, %v527_v62  ;;  %vm796_vm14 = vcmask 1043496   ;;  %vm809_vm15 = vcmask 1006592  }
 0x3a9   : > { %536 = vst [vmem:[#allocation3 + $0x8] sm:$0xf] %v531_v63 }
 0x3ab   : > { %v546_v2 = vpop.permute.xlu1 %545 }
 0x3ac   : > { %v548_v3 = vsel %vm547_vm6, %v544_v1, %v546_v2  ;;  %553 = vst.msk [vmem:[#allocation3 + $0x18] sm:$0xf] %vm552_vm7, %v546_v2  ;;  %vm814_vm6 = vcmask 1002496   ;;  %vm816_vm7 = vcmask 1044440  }
 0x3ad   : > { %551 = vst [vmem:[#allocation3 + $0x10] sm:$0xf] %v548_v3  ;;  %555 = vst.msk [vmem:[#allocation3 + $0x18] sm:$0xf] %vm554_vm10, %v1515_v0  ;;  %v952_v3 = vld [vmem:[#allocation8 + $0x14] sm:$0xf] }
 0x3af   : > { %v556_v4 = vld [vmem:[#allocation3] sm:$0xff] }
 0x3b0   : > { %655 = vst.msk [vmem:[#allocation3] sm:$0xf] %vm252_vm0, %v1515_v0  ;;  %v557_v5 = vld [vmem:[#allocation3 + $0x8] sm:$0xff] }
 0x3b1   : > { %672 = vst [vmem:[#allocation3 + $0x8] sm:$0xf0] %v1730_v28 }
 0x3b4   : > { %v559_v6 = vld [vmem:[#allocation3 + $0x18] sm:$0xf]  ;;  %v558_v7 = vld [vmem:[#allocation3 + $0x10] sm:$0xf] }
 0x3b5   : > { %v1225_v8 = vpack.c.bf16 %v559_v6, %v557_v5  ;;  %v1228_v9 = vpack.c.bf16 %v558_v7, %v556_v4 }
 0x3b7   : > { %1227 = vmatprep.subr.msk.bf16.mxu0 %vm1716_vm8, %v1225_v8 }
 0x3b8   : > { %1230 = vmatpush1.bf16.msk.msra.mxu0 %vm1716_vm8, %v1228_v9 }
 0x3bb   : > { %1194 = vmatmul.mubr.msk.f32.vlgmr.msra.gmra.mrb[2].mxu0 %vm295_vm9, %v561_v10 }
 0x3bc   : > { %904 = vmatprep.mubr.f32.mxu0 %v1515_v0  ;;  %v567_v11 = vpop.permute.xlu1 %566 }
 0x3c0   : > { %v661_v21 = vpop.permute.xlu1 %660 }
 0x48e   : > { %v644_v12 = vpop.f32.mrb[2].mxu0 }
 0x48f   : > { %v645_v13 = vadd.f32 %v644_v12, %v567_v11  ;;  %v646_v14 = vpop.f32.mrb[3].mxu0 }
 0x491   : > { %v649_v15 = vsel %vm1733_vm12, %v645_v13, 0.0 }
 0x492   : > { %v651_v16 = vmul.f32 0.01, %v649_v15 }
 0x494   : > { %v653_v17 = vmax.f32 %v649_v15, %v651_v16  ;;  %v950_v15 = vld [vmem:[#allocation5 + $0x14] sm:$0xf] }
 0x496   : > { %v667_v19 = vrot.slane %v653_v17, 4  ;;  %673 = vrot.lane.b32.xlu1 %v653_v17, %s1517_s21  ;;  %658 = vrot.lane.b32.xlu0 %v653_v17, %s1516_s5 }
 0x498   : > { %671 = vst [vmem:[#allocation3] sm:$0xf0] %v667_v19 }
 0x49a   : > { %675 = vrot.lane.b32.xlu0 %v1515_v0, %s1517_s21 }
 0x49e   : > { %693 = vperm.xlu0 %1338, %v690_v20  }
 0x4a2   : > { %790 = vrot.lane.b32.xlu0 %v1515_v0, %s1522_s6 }
 0x508   : > { %v659_v22 = vpop.permute.xlu0 %658  ;;  %v674_v24 = vpop.permute.xlu1 %673 }
 0x509   : > { %v662_v23 = vsel %vm260_vm4, %v659_v22, %v661_v21  ;;  %665 = vst.msk [vmem:[#allocation3] sm:$0xf] %vm264_vm1, %v659_v22 }
 0x50a   : > { %666 = vst [vmem:[#allocation3 + $0x8] sm:$0xf] %v662_v23 }
 0x50c   : > { %v676_v25 = vpop.permute.xlu0 %675 }
 0x50d   : > { %v677_v26 = vsel %vm275_vm5, %v674_v24, %v676_v25  ;;  %681 = vst.msk [vmem:[#allocation3 + $0x18] sm:$0xf] %vm280_vm2, %v676_v25 }
 0x50e   : > { %680 = vst [vmem:[#allocation3 + $0x10] sm:$0xf] %v677_v26  ;;  %682 = vst.msk [vmem:[#allocation3 + $0x18] sm:$0xf] %vm282_vm3, %v1515_v0 }
 0x510   : > { %v683_v31 = vld [vmem:[#allocation3] sm:$0xff] }
 0x511   : > { %v684_v27 = vld [vmem:[#allocation3 + $0x8] sm:$0xff]  ;;  %785 = vst.msk [vmem:[#allocation3] sm:$0xf] %vm784_vm11, %v1515_v0 }
 0x512   : > { %804 = vst [vmem:[#allocation3 + $0x8] sm:$0xf0] %v1730_v28 }
 0x515   : > { %v686_v30 = vld [vmem:[#allocation3 + $0x18] sm:$0xf]  ;;  %v685_v32 = vld [vmem:[#allocation3 + $0x10] sm:$0xf] }
 0x516   : > { %v1231_v33 = vpack.c.bf16 %v686_v30, %v684_v27  ;;  %v1234_v34 = vpack.c.bf16 %v685_v32, %v683_v31 }
 0x518   : > { %1233 = vmatprep.subr.msk.bf16.mxu1 %vm1716_vm8, %v1231_v33 }
 0x519   : > { %1236 = vmatpush1.bf16.msk.msra.mxu1 %vm1716_vm8, %v1234_v34 }
 0x51c   : > { %1197 = vmatmul.mubr.msk.f32.vlgmr.msra.gmra.mrb[2].mxu1 %vm295_vm9, %v688_v35 }
 0x51d   : > { %1031 = vmatprep.mubr.f32.mxu1 %v1515_v0  ;;  %v694_v36 = vpop.permute.xlu0 %693 }
 0x521   : > { %v791_v46 = vpop.permute.xlu0 %790 }
 0x5ef   : > { %v771_v37 = vpop.f32.mrb[2].mxu1 }
 0x5f0   : > { %v772_v38 = vadd.f32 %v771_v37, %v694_v36  ;;  %v773_v39 = vpop.f32.mrb[3].mxu1 }
 0x5f2   : > { %v776_v40 = vadd.f32 %v772_v38, %v1756_v56 }
 0x5f4   : > { %v1797_v41 = vsel %vm1733_vm12, %v776_v40, 0.0 }
 0x5f5   : > { %v780_v42 = vmul.f32 0.01, %v1797_v41 }
 0x5f7   : > { %v782_v43 = vmax.f32 %v1797_v41, %v780_v42 }
 0x5f9   : > { %805 = vrot.lane.b32.xlu0 %v782_v43, %s1523_s7  ;;  %v799_v44 = vrot.slane %v782_v43, 4  ;;  %788 = vrot.lane.b32.xlu1 %v782_v43, %s1522_s6 }
 0x5fb   : > { %803 = vst [vmem:[#allocation3] sm:$0xf0] %v799_v44 }
 0x5fd   : > { %807 = vrot.lane.b32.xlu1 %v1515_v0, %s1523_s7 }
 0x601   : > { %828 = vperm.xlu1 %1339, %v825_v45  }
 0x605   : > { %922 = vrot.lane.b32.xlu1 %v1515_v0, %s1516_s5 }
 0x66b   : > { %v789_v47 = vpop.permute.xlu1 %788  ;;  %v806_v49 = vpop.permute.xlu0 %805 }
 0x66c   : > { %v793_v48 = vsel %vm792_vm13, %v789_v47, %v791_v46  ;;  %797 = vst.msk [vmem:[#allocation3] sm:$0xf] %vm796_vm14, %v789_v47 }
 0x66d   : > { %798 = vst [vmem:[#allocation3 + $0x8] sm:$0xf] %v793_v48 }
 0x66f   : > { %v808_v50 = vpop.permute.xlu1 %807 }
 0x670   : > { %v810_v51 = vsel %vm809_vm15, %v806_v49, %v808_v50  ;;  %815 = vst.msk [vmem:[#allocation3 + $0x18] sm:$0xf] %vm814_vm6, %v808_v50 }
 0x671   : > { %813 = vst [vmem:[#allocation3 + $0x10] sm:$0xf] %v810_v51  ;;  %817 = vst.msk [vmem:[#allocation3 + $0x18] sm:$0xf] %vm816_vm7, %v1515_v0 }
 0x673   : > { %v818_v52 = vld [vmem:[#allocation3] sm:$0xff] }
 0x674   : > { %v819_v53 = vld [vmem:[#allocation3 + $0x8] sm:$0xff]  ;;  %917 = vst.msk [vmem:[#allocation3] sm:$0xf] %vm252_vm0, %v1515_v0  ;;  %vm1046_vm0 = vcmask 949248  }
 0x675   : > { %934 = vst [vmem:[#allocation3 + $0x8] sm:$0xf0] %v1730_v28 }
 0x678   : > { %v821_v54 = vld [vmem:[#allocation3 + $0x18] sm:$0xf]  ;;  %v820_v55 = vld [vmem:[#allocation3 + $0x10] sm:$0xf] }
 0x679   : > { %v1237_v56 = vpack.c.bf16 %v821_v54, %v819_v53  ;;  %v1240_v57 = vpack.c.bf16 %v820_v55, %v818_v52 }
 0x67b   : > { %1239 = vmatprep.subr.msk.bf16.mxu0 %vm1716_vm8, %v1237_v56 }
 0x67c   : > { %1242 = vmatpush1.bf16.msk.msra.mxu0 %vm1716_vm8, %v1240_v57 }
 0x67f   : > { %1200 = vmatmul.mubr.msk.f32.vlgmr.msra.gmra.mrb[4].mxu0 %vm295_vm9, %v823_v58 }
 0x680   : > { %v829_v59 = vpop.permute.xlu1 %828 }
 0x684   : > { %v923_v4 = vpop.permute.xlu1 %922 }
 0x752   : > { %v906_v60 = vpop.f32.mrb[4].mxu0 }
 0x753   : > { %v907_v61 = vadd.f32 %v906_v60, %v829_v59  ;;  %v908_v62 = vpop.f32.mrb[5].mxu0 }
 0x755   : > { %v911_v28 = vsel %vm1733_vm12, %v907_v61, 0.0 }
 0x756   : > { %v913_v63 = vmul.f32 0.01, %v911_v28 }
 0x758   : > { %v915_v1 = vmax.f32 %v911_v28, %v913_v63 }
 0x75a   : > { %v929_v2 = vrot.slane %v915_v1, 4  ;;  %935 = vrot.lane.b32.xlu1 %v915_v1, %s1517_s21  ;;  %920 = vrot.lane.b32.xlu0 %v915_v1, %s1516_s5  ;;  %s1424_s5 = sshll.u32 %s1525_s19, 4  ;;  %s1425_s5 = int_to_ptr.vmem [resolvable:$false] %s1424_s5 }
 0x75b   : > { %p1427_p8 = scmp.lt.s32.totalorder %s1839_s27, %s1425_s5 }
 0x75c   : > { %933 = vst [vmem:[#allocation3] sm:$0xf0] %v929_v2 }
 0x75e   : > { %937 = vrot.lane.b32.xlu0 %v1515_v0, %s1517_s21  ;;  %s1426_s21 = scalar_lea.vmem %s1425_s5, 128 }
 0x75f   : > { %p1428_p10 = scmp.lt.s32.totalorder %s1426_s21, %s1420_s29 }
 0x761   : > { %p1429_p11 = por %p1428_p10, %p1427_p8 }
 0x762   : > { %955 = vperm.xlu0 %1338, %v952_v3  }
 0x763   : > { %p1430_p2 = pnand %p1429_p11, %p1423_p1 }
 0x7cc   : > { %v921_v5 = vpop.permute.xlu0 %920  ;;  %v936_v29 = vpop.permute.xlu1 %935 }
 0x7cd   : > { %v924_v6 = vsel %vm260_vm4, %v921_v5, %v923_v4  ;;  %927 = vst.msk [vmem:[#allocation3] sm:$0xf] %vm264_vm1, %v921_v5 }
 0x7ce   : > { %928 = vst [vmem:[#allocation3 + $0x8] sm:$0xf] %v924_v6 }
 0x7d0   : > { %v938_v7 = vpop.permute.xlu0 %937 }
 0x7d1   : > { %v939_v8 = vsel %vm275_vm5, %v936_v29, %v938_v7  ;;  %943 = vst.msk [vmem:[#allocation3 + $0x18] sm:$0xf] %vm280_vm2, %v938_v7 }
 0x7d2   : > { %942 = vst [vmem:[#allocation3 + $0x10] sm:$0xf] %v939_v8  ;;  %944 = vst.msk [vmem:[#allocation3 + $0x18] sm:$0xf] %vm282_vm3, %v1515_v0 }
 0x7d4   : > { %v945_v9 = vld [vmem:[#allocation3] sm:$0xff] }
 0x7d5   : > { %v946_v10 = vld [vmem:[#allocation3 + $0x8] sm:$0xff] }
 0x7d9   : > { %v948_v11 = vld [vmem:[#allocation3 + $0x18] sm:$0xf]  ;;  %v947_v12 = vld [vmem:[#allocation3 + $0x10] sm:$0xf] }
 0x7da   : > { %v1243_v13 = vpack.c.bf16 %v948_v11, %v946_v10  ;;  %v1246_v14 = vpack.c.bf16 %v947_v12, %v945_v9 }
 0x7dc   : > { %1245 = vmatprep.subr.msk.bf16.mxu1 %vm1716_vm8, %v1243_v13 }
 0x7dd   : > { %1248 = vmatpush1.bf16.msk.msra.mxu1 %vm1716_vm8, %v1246_v14 }
 0x7e0   : > { %1203 = vmatmul.mubr.msk.f32.vlgmr.msra.gmra.mrb[4].mxu1 %vm295_vm9, %v950_v15 }
 0x7e1   : > { %v956_v16 = vpop.permute.xlu0 %955 }
 0x8b3   : > { %v1033_v17 = vpop.f32.mrb[4].mxu1 }
 0x8b4   : > { %v1034_v0 = vadd.f32 %v1033_v17, %v956_v16  ;;  %v1035_v19 = vpop.f32.mrb[5].mxu1 }
 0x8b5   : > { %v1036_v20 = vadd.f32 %v1035_v19, %v956_v16 }
 0x8b6   : > { %v1038_v21 = vadd.f32 %v1034_v0, %v1797_v41 }
 0x8b7   : > { %1044 = vrot.lane.b32.xlu0 %v1036_v20, %s1524_s8 }
 0x8b8   : > { %1042 = vrot.lane.b32.xlu1 %v1038_v21, %s1524_s8 }
 0x929   : > { %v1045_v18 = vpop.permute.xlu0 %1044 }
 0x92a   : > { %v1043_v22 = vpop.permute.xlu1 %1042 }
 0x92b   : > { %v1047_v23 = vsel %vm1046_vm0, %v1043_v22, %v1045_v18 }
 0x92c   : > { %1049 = vst [vmem:[%s166_s28] sm:$0xf] %v1047_v23 }
 0x92d   : > { %1433 = shalt.err (!%p1430_p2)
}
 0x92e   : > { %s1434_s30 = scalar_lea.hbm %s1837_s18, 64  ;;  %s1438_s23 = scalar_lea.hbm %s1891_s3, 128 }
 0x92f   : > { %p1435_p3 = scmp.ne.s32.totalorder %s1837_s18, %s1434_s30  ;;  %p1439_p7 = scmp.lt.u32.totalorder %s1837_s18, %s1891_s3 }
 0x930   : > { %p1440_p9 = scmp.lt.u32.totalorder %s1438_s23, %s1434_s30  ;;  %p1442_p0 = scmp.lt.u32.totalorder %s1434_s30, %s1837_s18 }
 0x931   : > { %p1436_p5 = pnand %p1435_p3, %p1907_p4 }
 0x932   : > { %p1441_p12 = por %p1440_p9, %p1439_p7 }
 0x933   : > { %p1437_p6 = pneg %p1436_p5 }
 0x934   : > { %p1443_p13 = por %p1442_p0, %p1441_p12 }
 0x936   : > { %p1444_p1 = pnand %p1443_p13, %p1437_p6 }
 0x938   : > { %1447 = shalt.err (!%p1444_p1)
}
 0x939   : > { %1257 = dma.vmem_to_hbm [thread:$0]  (%p1907_p4), %s1839_s27, 64, %s1837_s18, %s1051_s15  }
 0x93a PF: > { %p1274_p8 = scmp.ge.s32.totalorder %s1508_s17, 2  ;;  %s1077_s7 = sand.u32 1, %s1488_s12  }
 0x93b   : > { %p1908_p10 = scmp.ne.s32.totalorder %s1897_s24, 0  ;;  %s1078_s8 = scalar_lea.sflag [#allocation7], %s1077_s7 }
 0x93d   : > { %p1267_p11 = pnand %p1274_p8, %p1908_p10 }
 0x93f   : > { %1483 = dma.done.wait (!%p1267_p11), %s1078_s8, 64  }
 0x940   : > { %1485 = vsyncadd (!%p1267_p11), %s1078_s8, 4294967232  ;;  %s18_s17 = sadd.s32 1, %s1508_s17   ;;  %s1909_s12 = smov %s1492_s13 }
 0x941   : > { %p15_p2 = scmp.ge.s32.totalorder %s18_s17, 4   ;;  %s1910_s13 = smov %s1496_s14 }
 0x942   : > { %s1911_s14 = smov %s1599_s25  ;;  %s1912_s15 = smov %s1504_s16 }
 0x943   : > { %s1913_s16 = smov %s1915_s20  ;;  %17 = sbr.rel (!%p15_p2) target bundleno = 6 (0x6), region = 104 }
 0x94a   :  { %1083 = vsyncpa [#allocation6], 1 }
 0x94b   :  { %1085 = vsyncpa [#allocation6 + $0x1], 1 }
 0x94c   :  { %1086 = vsyncpa [#allocation9], 1 }
 0x94d   :  { %1087 = vsyncpa [#allocation7], 1 }
 0x94e   :  { %1089 = vsyncpa [#allocation7 + $0x1], 1 }
 0x94f   :  { %1090 = vsyncmov [#allocation4] }
 0x952   :  { %s1091_s22 = vpop.sfrf %1090 }
 0x953   :  { %p1208_p4 = scmp.ne.s32.totalorder %s1091_s22, 0 }
 0x955   :  { %1095 = shalt.err (%p1208_p4)  }
 0x956   :  { %1097 = vsyncmov [#allocation4 + $0x1] }
 0x959   :  { %s1098_s24 = vpop.sfrf %1097 }
 0x95a   :  { %p1209_p3 = scmp.ne.s32.totalorder %s1098_s24, 0 }
 0x95c   :  { %1102 = shalt.err (%p1209_p3)  }

</bundles_post_ra>
